<compile_context>
chip_gen: v7x
topology: tpu7x:2x2x1
jax: 0.10.0
libtpu: 0.0.40
codegen_flags: <defaults>
</compile_context>

<pallas_src>
import functools

import jax
import jax.numpy as jnp
from jax.experimental import pallas as pl
from jax.experimental.pallas import tpu as pltpu


_SQRT_HALF = 0.7071067811865476


def _gelu_exact(h):
    # Exact (erf-based) GELU -> matches torch.nn.functional.gelu default.
    return 0.5 * h * (1.0 + jax.lax.erf(h * jnp.float32(_SQRT_HALF)))


# ---------------------------------------------------------------------------
# Kernels
# ---------------------------------------------------------------------------

def _intermediate_fullk_kernel(x_ref, w_ref, b_ref, o_ref):
    """Single-K-step variant: whole K panel resident, no accumulator scratch."""
    h = jnp.dot(x_ref[...], w_ref[...], preferred_element_type=jnp.float32)
    h = h + b_ref[...].astype(jnp.float32)
    # Dropout (eval mode) == identity.
    o_ref[...] = _gelu_exact(h).astype(o_ref.dtype)


def _intermediate_ksplit_kernel(x_ref, w_ref, b_ref, o_ref, acc_ref):
    """K-reduction variant: f32 accumulator in VMEM, epilogue at last K step."""
    k = pl.program_id(2)

    @pl.when(k == 0)
    def _():
        acc_ref[...] = jnp.zeros_like(acc_ref)

    acc_ref[...] += jnp.dot(
        x_ref[...], w_ref[...], preferred_element_type=jnp.float32
    )

    @pl.when(k == pl.num_programs(2) - 1)
    def _():
        h = acc_ref[...] + b_ref[...].astype(jnp.float32)
        o_ref[...] = _gelu_exact(h).astype(o_ref.dtype)


# ---------------------------------------------------------------------------
# Tiling helpers
# ---------------------------------------------------------------------------

def _round_up(v, m):
    return ((v + m - 1) // m) * m


def _sublane_multiple(dtype):
    # Sub-32-bit dtypes pack along sublanes: f32 -> 8, bf16 -> 16, int8/fp8 -> 32.
    return max(8, 8 * (4 // jnp.dtype(dtype).itemsize))


def _vmem_limits():
    """(pipeline-buffer budget, vmem_limit_bytes) derived from this chip's VMEM."""
    cap = 64 * 1024 * 1024  # conservative fallback (v7x-sized per-TC VMEM)
    try:
        info = pltpu.get_tpu_info()
        cap = int(getattr(info, "vmem_capacity_bytes", cap) or cap)
    except Exception:
        pass
    # Leave real headroom for compiler-internal scratch (review: 48/64 is tight).
    limit = min(cap - 24 * 1024 * 1024, (cap * 3) // 4)   # 128 MiB -> 96, 64 MiB -> 40
    limit = max(limit, 16 * 1024 * 1024)
    budget = (limit * 4) // 5                             # 96 -> ~77, 40 -> 32
    return budget, limit


def _lane_tiles(total, cap):
    """Multiples of 128 that exactly divide `total` and are <= cap, descending."""
    n = total // 128
    cap_d = max(1, min(cap, total) // 128)
    divs = [128 * d for d in range(1, n + 1) if n % d == 0 and d <= cap_d]
    return sorted(divs, reverse=True) if divs else [128]


def _select_tiling(N, H_p, O_p, x_dtype, w_dtype, out_dtype, budget,
                   tm_req, tn_req, tk_req):
    """Pick (tm, tn, tk, o_outer) minimizing modeled HBM traffic within budget."""
    xb = jnp.dtype(x_dtype).itemsize
    wb = jnp.dtype(w_dtype).itemsize
    ob = jnp.dtype(out_dtype).itemsize

    sub = _sublane_multiple(x_dtype)
    tm = min(tm_req, _round_up(N, sub))
    tm = _round_up(tm, sub)
    n_p = _round_up(N, tm)

    tn_cands = _lane_tiles(O_p, tn_req)
    tk_cands = _lane_tiles(H_p, H_p if tk_req is None else tk_req)

    def footprint(tn, tk):
        # Double-buffered input/output blocks (+ f32 scratch when K is split).
        buf = 2 * (tm * tk * xb + tk * tn * wb + tm * tn * ob + tn * 4)
        if tk != H_p:
            buf += tm * tn * 4
        return buf

    def traffic(tn, tk, o_outer):
        w_bytes = H_p * O_p * wb
        x_bytes = n_p * H_p * xb
        if tk == H_p:
            # Outer-loop operand's panel stays resident -> streamed once.
            w_reads = 1 if o_outer else (n_p // tm)
            x_reads = (O_p // tn) if o_outer else 1
        else:
            w_reads = n_p // tm
            x_reads = O_p // tn
        return w_reads * w_bytes + x_reads * x_bytes + n_p * O_p * ob

    best = None
    for tk in tk_cands:
        for tn in tn_cands:
            if footprint(tn, tk) > budget:
                continue
            for o_outer in (True, False):
                key = (traffic(tn, tk, o_outer), -tk, -tn)
                if best is None or key < best[0]:
                    best = (key, (tm, tn, tk, o_outer))
    if best is None:
        # Nothing fits the budget (pathological shapes); take the smallest tiles.
        best = (None, (tm, tn_cands[-1], tk_cands[-1], O_p >= n_p))
    return best[1]


# ---------------------------------------------------------------------------
# Parameter prep (one-time, at parameter-load) and forward wrapper
# ---------------------------------------------------------------------------

def prepare_intermediate_params(weight, bias):
    """Transpose torch-layout weight [O, H] -> [H, O] and pad to lane multiples
    ONCE, so the per-call forward never copies/pads the weight."""
    O, H = weight.shape
    H_p = _round_up(H, 128)
    O_p = _round_up(O, 128)
    w_t = jnp.asarray(weight).T
    if (H_p, O_p) != (H, O):
        w_t = jnp.pad(w_t, ((0, H_p - H), (0, O_p - O)))
    b = jnp.asarray(bias)
    if O_p != O:
        b = jnp.pad(b, ((0, O_p - O),))
    return w_t, b.reshape(1, O_p), O


@functools.partial(jax.jit, static_argnames=("out_features", "tm", "tn", "tk"))
def intermediate_forward(x, weight_t, bias2d, out_features, *, tm=512, tn=1024, tk=None):
    """Intermediate forward pass.

    x        : [..., H]   (any leading dims)
    weight_t : [H_p, O_p] (pre-transposed + lane-padded, from prepare_intermediate_params)
    bias2d   : [1, O_p]
    """
    orig_shape = x.shape
    H = orig_shape[-1]
    H_p, O_p = weight_t.shape
    O = out_features

    x2d = x.reshape(-1, H)
    N = x2d.shape[0]

    budget, vmem_limit = _vmem_limits()
    tm_e, tn_e, tk_e, o_outer = _select_tiling(
        N, H_p, O_p, x2d.dtype, weight_t.dtype, x2d.dtype, budget, tm, tn, tk
    )

    N_p = _round_up(N, tm_e)
    if (N_p, H_p) != (N, H):
        x2d = jnp.pad(x2d, ((0, N_p - N), (0, H_p - H)))

    grid_m = N_p // tm_e
    grid_o = O_p // tn_e
    grid_k = H_p // tk_e
    full_k = grid_k == 1

    # Block index maps: x -> (i, k), W^T -> (k, j), bias -> (0, j), out -> (i, j)
    if full_k:
        if o_outer:
            grid = (grid_o, grid_m)
            x_map = lambda j, i: (i, 0)
            w_map = lambda j, i: (0, j)
            b_map = lambda j, i: (0, j)
            o_map = lambda j, i: (i, j)
        else:
            grid = (grid_m, grid_o)
            x_map = lambda i, j: (i, 0)
            w_map = lambda i, j: (0, j)
            b_map = lambda i, j: (0, j)
            o_map = lambda i, j: (i, j)
        kernel = _intermediate_fullk_kernel
        scratch = ()
        semantics = ("parallel", "parallel")
    else:
        if o_outer:
            grid = (grid_o, grid_m, grid_k)
            x_map = lambda j, i, k: (i, k)
            w_map = lambda j, i, k: (k, j)
            b_map = lambda j, i, k: (0, j)
            o_map = lambda j, i, k: (i, j)
        else:
            grid = (grid_m, grid_o, grid_k)
            x_map = lambda i, j, k: (i, k)
            w_map = lambda i, j, k: (k, j)
            b_map = lambda i, j, k: (0, j)
            o_map = lambda i, j, k: (i, j)
        kernel = _intermediate_ksplit_kernel
        scratch = (pltpu.VMEM((tm_e, tn_e), jnp.float32),)
        semantics = ("parallel", "parallel", "arbitrary")

    xb = jnp.dtype(x2d.dtype).itemsize
    wb = jnp.dtype(weight_t.dtype).itemsize
    cost = pl.CostEstimate(
        flops=2 * N * H * O,
        transcendentals=N * O,
        bytes_accessed=N * H * xb + H * O * wb + O * 4 + N * O * xb,
    )

    out = pl.pallas_call(
        kernel,
        out_shape=jax.ShapeDtypeStruct((N_p, O_p), x.dtype),
        grid_spec=pltpu.PrefetchScalarGridSpec(
            num_scalar_prefetch=0,
            grid=grid,
            in_specs=[
                pl.BlockSpec((tm_e, tk_e), x_map),   # activations
                pl.BlockSpec((tk_e, tn_e), w_map),   # W^T panel
                pl.BlockSpec((1, tn_e), b_map),      # bias (re-DMA'd only on j change)
            ],
            out_specs=pl.BlockSpec((tm_e, tn_e), o_map),
            scratch_shapes=scratch,
        ),
        compiler_params=pltpu.CompilerParams(
            dimension_semantics=semantics,
            vmem_limit_bytes=vmem_limit,
        ),
        cost_estimate=cost,
    )(x2d, weight_t, bias2d)

    out = out[:N, :O]
    return out.reshape(*orig_shape[:-1], O)


# ---------------------------------------------------------------------------
# Self-test
# ---------------------------------------------------------------------------

if __name__ == "__main__":
    # Small config matching the module: batch=2, seq=8, hidden=32, intermediate=64.
    batch, seq, hidden_size, intermediate_size = 2, 8, 32, 64

    key = jax.random.PRNGKey(0)
    kx, kw, kb = jax.random.split(key, 3)

    x = jax.random.normal(kx, (batch, seq, hidden_size), dtype=jnp.float32)
    # Deterministic "nn.Linear"-style parameters (torch layout [O, H]).
    weight = jax.random.normal(
        kw, (intermediate_size, hidden_size), dtype=jnp.float32
    ) * 0.02
    bias = jax.random.normal(kb, (intermediate_size,), dtype=jnp.float32) * 0.02

    # One-time parameter prep (transpose + pad) outside the per-call path.
    weight_t, bias2d, out_features = prepare_intermediate_params(weight, bias)

    y = intermediate_forward(x, weight_t, bias2d, out_features)
    jax.block_until_ready(y)

    # Reference (erf GELU == torch default; eval-mode dropout == identity).
    ref = jax.nn.gelu(x @ weight.T + bias, approximate=False)
    assert y.shape == (batch, seq, intermediate_size)
    assert jnp.allclose(y, ref, atol=1e-5, rtol=1e-5)

    # Second check: bf16 operands (sublane-16 clamp) + forced K-split path
    # (3-D grid with f32 accumulator), small explicit tiles.
    b2, s2, h2, o2 = 4, 64, 256, 512
    k2x, k2w, k2b = jax.random.split(jax.random.PRNGKey(1), 3)
    x2 = jax.random.normal(k2x, (b2, s2, h2), dtype=jnp.bfloat16)
    w2 = (jax.random.normal(k2w, (o2, h2), dtype=jnp.float32) * 0.02).astype(jnp.bfloat16)
    bi2 = (jax.random.normal(k2b, (o2,), dtype=jnp.float32) * 0.02).astype(jnp.bfloat16)
    w2_t, b2d2, of2 = prepare_intermediate_params(w2, bi2)
    y2 = intermediate_forward(x2, w2_t, b2d2, of2, tm=64, tn=128, tk=128)
    jax.block_until_ready(y2)
    ref2 = jax.nn.gelu(
        jnp.einsum(
            "bsh,oh->bso",
            x2.astype(jnp.float32),
            w2.astype(jnp.float32),
            precision=jax.lax.Precision.HIGHEST,
        )
        + bi2.astype(jnp.float32),
        approximate=False,
    )
    assert y2.shape == (b2, s2, o2)
    assert jnp.allclose(y2.astype(jnp.float32), ref2, atol=3e-2, rtol=3e-2)

    print("KERNEL_OK")
</pallas_src>

<mosaic_0001>
module attributes {stable_mosaic.version = 11 : i64} {
  func.func @_intermediate_fullk_kernel(%arg0: i32, %arg1: i32, %arg2: memref<16x128xf32, #tpu.memory_space<vmem>>, %arg3: memref<128x128xf32, #tpu.memory_space<vmem>>, %arg4: memref<1x128xf32, #tpu.memory_space<vmem>>, %arg5: memref<16x128xf32, #tpu.memory_space<vmem>>) attributes {dimension_semantics = [#tpu.dimension_semantics<parallel>, #tpu.dimension_semantics<parallel>], iteration_bounds = array<i64: 1, 1>, scalar_prefetch = 0 : i64, scratch_operands = 0 : i64, tpu.core_type = #tpu.core_type<tc>, window_params = [{transform_indices = @transform_0, window_bounds = array<i64: 16, 128>}, {transform_indices = @transform_1, window_bounds = array<i64: 128, 128>}, {transform_indices = @transform_2, window_bounds = array<i64: 1, 128>}, {transform_indices = @transform_3, window_bounds = array<i64: 16, 128>}]} {
    %c0 = arith.constant 0 : index
    %c0_0 = arith.constant 0 : index
    %0 = vector.load %arg2[%c0, %c0_0] : memref<16x128xf32, #tpu.memory_space<vmem>>, vector<16x128xf32>
    %c0_1 = arith.constant 0 : index
    %c0_2 = arith.constant 0 : index
    %1 = vector.load %arg3[%c0_1, %c0_2] : memref<128x128xf32, #tpu.memory_space<vmem>>, vector<128x128xf32>
    %cst = arith.constant dense<0.000000e+00> : vector<16x128xf32>
    %2 = tpu.matmul %0, %1, %cst {dimension_numbers = #tpu.dot_dimension_numbers<[1], [0], [0], [1], [0, 0, 1, 1], [], []>} : vector<16x128xf32>, vector<128x128xf32>, vector<16x128xf32> -> vector<16x128xf32>
    %c0_3 = arith.constant 0 : index
    %c0_4 = arith.constant 0 : index
    %3 = vector.load %arg4[%c0_3, %c0_4] : memref<1x128xf32, #tpu.memory_space<vmem>>, vector<1x128xf32>
    %4 = vector.broadcast %3 : vector<1x128xf32> to vector<16x128xf32>
    %5 = arith.addf %2, %4 : vector<16x128xf32>
    %cst_5 = arith.constant 5.000000e-01 : f32
    %6 = vector.broadcast %cst_5 : f32 to vector<16x128xf32>
    %7 = arith.mulf %6, %5 : vector<16x128xf32>
    %cst_6 = arith.constant 0.707106769 : f32
    %8 = vector.broadcast %cst_6 : f32 to vector<16x128xf32>
    %9 = arith.mulf %5, %8 : vector<16x128xf32>
    %10 = math.erf %9 : vector<16x128xf32>
    %cst_7 = arith.constant 1.000000e+00 : f32
    %11 = vector.broadcast %cst_7 : f32 to vector<16x128xf32>
    %12 = arith.addf %11, %10 : vector<16x128xf32>
    %13 = arith.mulf %7, %12 : vector<16x128xf32>
    %c0_8 = arith.constant 0 : index
    %c0_9 = arith.constant 0 : index
    %14 = vector.load %arg5[%c0_8, %c0_9] : memref<16x128xf32, #tpu.memory_space<vmem>>, vector<16x128xf32>
    tpu.vector_store %arg5[%c0_8, %c0_9], %13 {strides = array<i32>} : memref<16x128xf32, #tpu.memory_space<vmem>>, vector<16x128xf32>,
    return
  }
  func.func @transform_0(%arg0: i32, %arg1: i32) -> (i32, i32) {
    %c0_i32 = arith.constant 0 : i32
    %c0_i32_0 = arith.constant 0 : i32
    return %arg1, %c0_i32 : i32, i32
  }
  func.func @transform_1(%arg0: i32, %arg1: i32) -> (i32, i32) {
    %c0_i32 = arith.constant 0 : i32
    %c0_i32_0 = arith.constant 0 : i32
    return %c0_i32, %arg0 : i32, i32
  }
  func.func @transform_2(%arg0: i32, %arg1: i32) -> (i32, i32) {
    %c0_i32 = arith.constant 0 : i32
    %c0_i32_0 = arith.constant 0 : i32
    return %c0_i32, %arg0 : i32, i32
  }
  func.func @transform_3(%arg0: i32, %arg1: i32) -> (i32, i32) {
    %c0_i32 = arith.constant 0 : i32
    return %arg1, %arg0 : i32, i32
  }
}

</mosaic_0001>

<bundles_post_ra>
// kernel: intermediate_forward.1
= control target key start
LH: loop header
LB: loop body
LE: loop exit
PB: predicated region body
PF: predicated region fallthrough
CT: control target
= control target key end

     0   :  { %8 = vsyncpa [#allocation3], 0  ;;  %s262_s12 = smov [#allocation2]   ;;  %s312_s0 = inlined_call_operand.vmem [shape: f32[16,128], index: 0, kind: input, shape index: {}]   ;;  %s313_s1 = inlined_call_operand.hbm [shape: f32[128,128], index: 1, kind: input, shape index: {}]   ;;  %s314_s2 = inlined_call_operand.vmem [shape: f32[1,128], index: 2, kind: input, shape index: {}]   ;;  %s315_s3 = inlined_call_operand.vmem [shape: f32[16,128], index: 3, kind: output, shape index: {}]  }
   0x1   :  { %s16_s13 = sshll.u32 %s262_s12, 4  ;;  %s238_s16 = scalar_lea.hbm %s313_s1, 2048  ;;  %s17_s13 = int_to_ptr.vmem [resolvable:$true] %s16_s13 }
   0x2   :  { %p239_p0 = scmp.ne.s32.totalorder %s313_s1, %s238_s16  ;;  %p242_p1 = scmp.lt.u32.totalorder %s238_s16, %s313_s1 }
   0x4   :  { %p244_p2 = pnand %p242_p1, %p239_p0 }
   0x6   :  { %247 = shalt.err (!%p244_p2)
}
   0x7   :  { %s248_s21 = scalar_lea.vmem %s17_s13, 2048  ;;  %p253_p4 = scmp.lt.s32.totalorder %s17_s13, %s17_s13 }
   0x8   :  { %p249_p3 = scmp.ne.s32.totalorder %s17_s13, %s248_s21  ;;  %p254_p5 = scmp.lt.s32.totalorder %s248_s21, %s248_s21 }
   0xa   :  { %p255_p6 = por %p254_p5, %p253_p4 }
   0xc   :  { %p256_p7 = pnand %p255_p6, %p249_p3 }
   0xe   :  { %259 = shalt.err (!%p256_p7)
}
   0xf   :  { %s263_s22 = smov 128   ;;  %s264_s23 = smov 8  }
  0x10   :  { %22 = dma.hbm_to_vmem [thread:$0]  %s313_s1, 2048, %s17_s13, [#allocation3], %s263_s22, %s263_s22, %s264_s23  }
  0x11   :  { %260 = dma.done.wait [#allocation3], 2048  }
  0x12   :  { %261 = vsyncadd [#allocation3], 4294965248  ;;  %v30_v0 = vld [vmem:[#allocation2] sm:$0xff]  ;;  %v31_v1 = vld [vmem:[#allocation2 + $0x8] sm:$0xff] }
  0x13   :  { %v32_v2 = vld [vmem:[#allocation2 + $0x10] sm:$0xff]  ;;  %v199_v3 = vpack.c.bf16 %v31_v1, %v30_v0  ;;  %v33_v4 = vld [vmem:[#allocation2 + $0x18] sm:$0xff]  ;;  %v34_v6 = vld [vmem:[#allocation2 + $0x20] sm:$0xff] }
  0x14   :  { %v203_v5 = vpack.c.bf16 %v33_v4, %v32_v2  ;;  %v35_v7 = vld [vmem:[#allocation2 + $0x28] sm:$0xff]  ;;  %v28_v9 = vld [vmem:[%s312_s0] sm:$0xff]  ;;  %v36_v10 = vld [vmem:[#allocation2 + $0x30] sm:$0xff] }
  0x15   :  { %200 = vmatprep.subr.bf16.mxu0 %v199_v3  ;;  %v207_v8 = vpack.c.bf16 %v35_v7, %v34_v6  ;;  %v37_v11 = vld [vmem:[#allocation2 + $0x38] sm:$0xff]  ;;  %196 = vmatprep.mubr.f32.mxu0 %v28_v9  ;;  %v38_v13 = vld [vmem:[#allocation2 + $0x40] sm:$0xff]  ;;  %v39_v14 = vld [vmem:[#allocation2 + $0x48] sm:$0xff] }
  0x16   :  { %202 = vmatpush3.bf16.msra.mxu0 %v199_v3  ;;  %v211_v12 = vpack.c.bf16 %v37_v11, %v36_v10  ;;  %v215_v15 = vpack.c.bf16 %v39_v14, %v38_v13  ;;  %v40_v16 = vld [vmem:[#allocation2 + $0x50] sm:$0xff]  ;;  %v41_v17 = vld [vmem:[#allocation2 + $0x58] sm:$0xff]  ;;  %v42_v19 = vld [vmem:[#allocation2 + $0x60] sm:$0xff] }
  0x17   :  { %204 = vmatprep.subr.bf16.mxu0 %v203_v5  ;;  %v219_v18 = vpack.c.bf16 %v41_v17, %v40_v16  ;;  %v43_v20 = vld [vmem:[#allocation2 + $0x68] sm:$0xff]  ;;  %v44_v22 = vld [vmem:[#allocation2 + $0x70] sm:$0xff]  ;;  %v45_v23 = vld [vmem:[#allocation2 + $0x78] sm:$0xff] }
  0x18   :  { %v223_v21 = vpack.c.bf16 %v43_v20, %v42_v19  ;;  %v227_v24 = vpack.c.bf16 %v45_v23, %v44_v22  ;;  %v29_v25 = vld [vmem:[%s312_s0 + $0x8] sm:$0xff]  ;;  %v145_v26 = vld [vmem:[%s314_s2] ss:$0 sm:$0xff] }
  0x1a   :  { %206 = vmatpush3.bf16.msra.mxu0 %v203_v5 }
  0x1b   :  { %208 = vmatprep.subr.bf16.mxu0 %v207_v8 }
  0x1e   :  { %210 = vmatpush3.bf16.msra.mxu0 %v207_v8 }
  0x1f   :  { %212 = vmatprep.subr.bf16.mxu0 %v211_v12 }
  0x22   :  { %214 = vmatpush3.bf16.msra.mxu0 %v211_v12 }
  0x23   :  { %216 = vmatprep.subr.bf16.mxu0 %v215_v15 }
  0x26   :  { %218 = vmatpush3.bf16.msra.mxu0 %v215_v15 }
  0x27   :  { %220 = vmatprep.subr.bf16.mxu0 %v219_v18 }
  0x2a   :  { %222 = vmatpush3.bf16.msra.mxu0 %v219_v18 }
  0x2b   :  { %224 = vmatprep.subr.bf16.mxu0 %v223_v21 }
  0x2e   :  { %226 = vmatpush3.bf16.msra.mxu0 %v223_v21 }
  0x2f   :  { %228 = vmatprep.subr.bf16.mxu0 %v227_v24 }
  0x32   :  { %230 = vmatpush3.bf16.msra.mxu0 %v227_v24 }
  0x35   :  { %197 = vmatmul.mubr.f32.vlgmr.msra.gmra.mrb[0].mxu0 %v29_v25 }
 0x108   :  { %v198_v27 = vpop.f32.mrb[0].mxu0 }
 0x109   :  { %v125_v28 = vadd.f32 %v198_v27, %v145_v26  ;;  %v119_v29 = vpop.f32.mrb[1].mxu0 }
 0x10a   :  { %v120_v30 = vadd.f32 %v145_v26, %v119_v29 }
 0x10b   :  { %v131_v31 = vmul.f32 0.70710677, %v125_v28  ;;  %v129_v35 = vmul.f32 0.5, %v125_v28 }
 0x10c   :  { %v130_v32 = vmul.f32 0.70710677, %v120_v30  ;;  %v128_v37 = vmul.f32 0.5, %v120_v30 }
 0x10d   :  { %234 = verf.f32 %v131_v31 }
 0x10e   :  { %236 = verf.f32 %v130_v32 }
 0x117   :  { %v235_v33 = vpop.eup %234 }
 0x118   :  { %v237_v34 = vpop.eup %236  ;;  %v135_v36 = vadd.f32 1.0, %v235_v33 }
 0x119   :  { %v134_v38 = vadd.f32 1.0, %v237_v34 }
 0x11a   :  { %v137_v39 = vmul.f32 %v135_v36, %v129_v35 }
 0x11b   :  { %v136_v40 = vmul.f32 %v134_v38, %v128_v37 }
 0x11c   :  { %139 = vst [vmem:[%s315_s3 + $0x8] sm:$0xff] %v137_v39 }
 0x11d   :  { %138 = vst [vmem:[%s315_s3] sm:$0xff] %v136_v40 }
 0x11e   :  { %144 = vsyncpa [#allocation3], 1 }

</bundles_post_ra>
